<compile_context>
chip_gen: v7x
topology: tpu7x:2x2x1
jax: 0.10.0
libtpu: 0.0.40
codegen_flags: <defaults>
</compile_context>

<pallas_src>
import functools

import jax
import jax.numpy as jnp
from jax.experimental import pallas as pl
from jax.experimental.pallas import tpu as pltpu


def _round_up(x, m):
    return ((x + m - 1) // m) * m


def _leaky_relu(x, negative_slope=0.01):
    return jnp.where(x >= 0, x, negative_slope * x)


def _make_actor_kernel(matmul_dtype):
    def actor_kernel(x_ref,
                     w1_ref, b1_ref,
                     w2_ref, b2_ref,
                     wh_ref, bh_ref,
                     out_ref):
        # fc1 + leaky_relu  (matmul operands in matmul_dtype, f32 accumulate)
        x = x_ref[...].astype(matmul_dtype)                       # (TB, S)
        h1 = jnp.dot(x, w1_ref[...].astype(matmul_dtype),
                     preferred_element_type=jnp.float32)
        h1 = _leaky_relu(h1 + b1_ref[...])                        # (TB, 64) f32

        # fc2 + leaky_relu
        h2 = jnp.dot(h1.astype(matmul_dtype), w2_ref[...].astype(matmul_dtype),
                     preferred_element_type=jnp.float32)
        h2 = _leaky_relu(h2 + b2_ref[...])                        # (TB, 8) f32

        # fused mu|sigma head: one matmul, one lane-denser store
        y = jnp.dot(h2.astype(matmul_dtype), wh_ref[...].astype(matmul_dtype),
                    preferred_element_type=jnp.float32)
        out_ref[...] = y + bh_ref[...]                            # (TB, 2*A)

    return actor_kernel


def actor_forward(x, params, *, block_b=512, matmul_dtype=jnp.float32):
    """x: (B, num_state) float32. params: dict with (in, out)-layout weights.

    Returns (mu, sigma), each (B, num_action) float32.
    """
    B, num_state = x.shape
    num_action = params["wmu"].shape[1]

    # Fuse the two heads in the wrapper (done once per call, trivial cost).
    w_head = jnp.concatenate([params["wmu"], params["wsig"]], axis=1)  # (8, 2A)
    b_head = jnp.concatenate([params["bmu"], params["bsig"]], axis=1)  # (1, 2A)

    # Batch tile: multiple of 8 (sublane), capped at block_b. Pad B up to a
    # multiple of TB so the grid covers it exactly.
    TB = _round_up(min(block_b, _round_up(B, 8)), 8)
    Bp = _round_up(B, TB)
    if Bp != B:
        x = jnp.pad(x, ((0, Bp - B), (0, 0)))
    grid = (Bp // TB,)

    # Weights/biases: full-array blocks, constant index_map -> VMEM-resident
    # across all grid steps (no re-DMA, no per-step broadcast re-derivation).
    def resident(a):
        return pl.BlockSpec(a.shape, lambda i: (0, 0))

    w1, b1, w2, b2 = params["w1"], params["b1"], params["w2"], params["b2"]

    out = pl.pallas_call(
        _make_actor_kernel(matmul_dtype),
        out_shape=jax.ShapeDtypeStruct((Bp, 2 * num_action), jnp.float32),
        grid=grid,
        in_specs=[
            pl.BlockSpec((TB, num_state), lambda i: (i, 0)),   # x: streamed
            resident(w1), resident(b1),
            resident(w2), resident(b2),
            resident(w_head), resident(b_head),
        ],
        out_specs=pl.BlockSpec((TB, 2 * num_action), lambda i: (i, 0)),
        compiler_params=pltpu.CompilerParams(
            dimension_semantics=("parallel",)),                # dual-TC on v7x
    )(x, w1, b1, w2, b2, w_head, b_head)

    out = out[:B]
    mu = out[:, :num_action]
    sigma = out[:, num_action:]
    return mu, sigma


def init_params(key, num_state, num_action):
    """Deterministic synthetic init (PyTorch Linear shapes, (in, out) layout)."""
    ks = jax.random.split(key, 8)

    def lin(kw, kb, fan_in, fan_out):
        bound = 1.0 / jnp.sqrt(fan_in)
        w = jax.random.uniform(kw, (fan_in, fan_out), jnp.float32, -bound, bound)
        b = jax.random.uniform(kb, (1, fan_out), jnp.float32, -bound, bound)
        return w, b

    w1, b1 = lin(ks[0], ks[1], num_state, 64)
    w2, b2 = lin(ks[2], ks[3], 64, 8)
    wmu, bmu = lin(ks[4], ks[5], 8, num_action)
    wsig, bsig = lin(ks[6], ks[7], 8, num_action)
    return dict(w1=w1, b1=b1, w2=w2, b2=b2,
                wmu=wmu, bmu=bmu, wsig=wsig, bsig=bsig)


def _reference(x, params):
    lr = lambda t: jnp.where(t >= 0, t, 0.01 * t)
    h1 = lr(x @ params["w1"] + params["b1"])
    h2 = lr(h1 @ params["w2"] + params["b2"])
    mu = h2 @ params["wmu"] + params["bmu"]
    sigma = h2 @ params["wsig"] + params["bsig"]
    return mu, sigma


if __name__ == "__main__":
    key = jax.random.PRNGKey(0)
    k_x, k_x2, k_p = jax.random.split(key, 3)

    num_state, num_action = 16, 4
    params = init_params(k_p, num_state, num_action)

    # --- small batch (grid = 1 step), f32 matmuls: exact-path check ---------
    B = 8
    x = jax.random.normal(k_x, (B, num_state), jnp.float32)
    mu, sigma = actor_forward(x, params)
    jax.block_until_ready((mu, sigma))
    mu_ref, sig_ref = _reference(x, params)
    assert jnp.allclose(mu, mu_ref, atol=1e-5), "mu mismatch (f32, B=8)"
    assert jnp.allclose(sigma, sig_ref, atol=1e-5), "sigma mismatch (f32, B=8)"

    # --- larger, non-aligned batch: exercises batch grid + padding ----------
    B2 = 300                       # padded to 384 with TB=128 -> grid=(3,)
    x2 = jax.random.normal(k_x2, (B2, num_state), jnp.float32)
    mu2, sigma2 = actor_forward(x2, params, block_b=128)
    jax.block_until_ready((mu2, sigma2))
    mu2_ref, sig2_ref = _reference(x2, params)
    assert jnp.allclose(mu2, mu2_ref, atol=1e-5), "mu mismatch (f32, B=300)"
    assert jnp.allclose(sigma2, sig2_ref, atol=1e-5), "sigma mismatch (f32, B=300)"

    # --- bf16 matmul-operand path (MXU-native on v6e/v7x), loose tolerance ---
    mu_bf, sigma_bf = actor_forward(x, params, matmul_dtype=jnp.bfloat16)
    jax.block_until_ready((mu_bf, sigma_bf))
    assert jnp.allclose(mu_bf, mu_ref, atol=0.1, rtol=0.1), "mu mismatch (bf16)"
    assert jnp.allclose(sigma_bf, sig_ref, atol=0.1, rtol=0.1), "sigma mismatch (bf16)"

    print("KERNEL_OK")
</pallas_src>

<mosaic_0001>
module attributes {stable_mosaic.version = 11 : i64} {
  func.func @actor_kernel(%arg0: i32, %arg1: memref<8x16xf32, #tpu.memory_space<vmem>>, %arg2: memref<16x64xf32, #tpu.memory_space<vmem>>, %arg3: memref<1x64xf32, #tpu.memory_space<vmem>>, %arg4: memref<64x8xf32, #tpu.memory_space<vmem>>, %arg5: memref<1x8xf32, #tpu.memory_space<vmem>>, %arg6: memref<8x8xf32, #tpu.memory_space<vmem>>, %arg7: memref<1x8xf32, #tpu.memory_space<vmem>>, %arg8: memref<8x8xf32, #tpu.memory_space<vmem>>) attributes {dimension_semantics = [#tpu.dimension_semantics<parallel>], iteration_bounds = array<i64: 1>, scalar_prefetch = 0 : i64, scratch_operands = 0 : i64, tpu.core_type = #tpu.core_type<tc>, window_params = [{transform_indices = @transform_0, window_bounds = array<i64: 8, 16>}, {pipeline_mode = #tpu.pipeline_mode<synchronous>, transform_indices = @transform_1, window_bounds = array<i64: 16, 64>}, {pipeline_mode = #tpu.pipeline_mode<synchronous>, transform_indices = @transform_2, window_bounds = array<i64: 1, 64>}, {pipeline_mode = #tpu.pipeline_mode<synchronous>, transform_indices = @transform_3, window_bounds = array<i64: 64, 8>}, {pipeline_mode = #tpu.pipeline_mode<synchronous>, transform_indices = @transform_4, window_bounds = array<i64: 1, 8>}, {pipeline_mode = #tpu.pipeline_mode<synchronous>, transform_indices = @transform_5, window_bounds = array<i64: 8, 8>}, {pipeline_mode = #tpu.pipeline_mode<synchronous>, transform_indices = @transform_6, window_bounds = array<i64: 1, 8>}, {transform_indices = @transform_7, window_bounds = array<i64: 8, 8>}]} {
    %c0 = arith.constant 0 : index
    %c0_0 = arith.constant 0 : index
    %0 = vector.load %arg1[%c0, %c0_0] : memref<8x16xf32, #tpu.memory_space<vmem>>, vector<8x16xf32>
    %c0_1 = arith.constant 0 : index
    %c0_2 = arith.constant 0 : index
    %1 = vector.load %arg2[%c0_1, %c0_2] : memref<16x64xf32, #tpu.memory_space<vmem>>, vector<16x64xf32>
    %cst = arith.constant dense<0.000000e+00> : vector<8x64xf32>
    %2 = tpu.matmul %0, %1, %cst {dimension_numbers = #tpu.dot_dimension_numbers<[1], [0], [0], [1], [0, 0, 1, 1], [], []>} : vector<8x16xf32>, vector<16x64xf32>, vector<8x64xf32> -> vector<8x64xf32>
    %c0_3 = arith.constant 0 : index
    %c0_4 = arith.constant 0 : index
    %3 = vector.load %arg3[%c0_3, %c0_4] : memref<1x64xf32, #tpu.memory_space<vmem>>, vector<1x64xf32>
    %4 = vector.broadcast %3 : vector<1x64xf32> to vector<8x64xf32>
    %5 = arith.addf %2, %4 : vector<8x64xf32>
    %cst_5 = arith.constant 0.000000e+00 : f32
    %6 = vector.broadcast %cst_5 : f32 to vector<8x64xf32>
    %7 = arith.cmpf oge, %5, %6 : vector<8x64xf32>
    %cst_6 = arith.constant 0.00999999977 : f32
    %8 = vector.broadcast %cst_6 : f32 to vector<8x64xf32>
    %9 = arith.mulf %8, %5 : vector<8x64xf32>
    %10 = arith.select %7, %5, %9 : vector<8x64xi1>, vector<8x64xf32>
    %c0_7 = arith.constant 0 : index
    %c0_8 = arith.constant 0 : index
    %11 = vector.load %arg4[%c0_7, %c0_8] : memref<64x8xf32, #tpu.memory_space<vmem>>, vector<64x8xf32>
    %cst_9 = arith.constant dense<0.000000e+00> : vector<8x8xf32>
    %12 = tpu.matmul %10, %11, %cst_9 {dimension_numbers = #tpu.dot_dimension_numbers<[1], [0], [0], [1], [0, 0, 1, 1], [], []>} : vector<8x64xf32>, vector<64x8xf32>, vector<8x8xf32> -> vector<8x8xf32>
    %c0_10 = arith.constant 0 : index
    %c0_11 = arith.constant 0 : index
    %13 = vector.load %arg5[%c0_10, %c0_11] : memref<1x8xf32, #tpu.memory_space<vmem>>, vector<1x8xf32>
    %14 = vector.broadcast %13 : vector<1x8xf32> to vector<8x8xf32>
    %15 = arith.addf %12, %14 : vector<8x8xf32>
    %cst_12 = arith.constant 0.000000e+00 : f32
    %16 = vector.broadcast %cst_12 : f32 to vector<8x8xf32>
    %17 = arith.cmpf oge, %15, %16 : vector<8x8xf32>
    %cst_13 = arith.constant 0.00999999977 : f32
    %18 = vector.broadcast %cst_13 : f32 to vector<8x8xf32>
    %19 = arith.mulf %18, %15 : vector<8x8xf32>
    %20 = arith.select %17, %15, %19 : vector<8x8xi1>, vector<8x8xf32>
    %c0_14 = arith.constant 0 : index
    %c0_15 = arith.constant 0 : index
    %21 = vector.load %arg6[%c0_14, %c0_15] : memref<8x8xf32, #tpu.memory_space<vmem>>, vector<8x8xf32>
    %cst_16 = arith.constant dense<0.000000e+00> : vector<8x8xf32>
    %22 = tpu.matmul %20, %21, %cst_16 {dimension_numbers = #tpu.dot_dimension_numbers<[1], [0], [0], [1], [0, 0, 1, 1], [], []>} : vector<8x8xf32>, vector<8x8xf32>, vector<8x8xf32> -> vector<8x8xf32>
    %c0_17 = arith.constant 0 : index
    %c0_18 = arith.constant 0 : index
    %23 = vector.load %arg7[%c0_17, %c0_18] : memref<1x8xf32, #tpu.memory_space<vmem>>, vector<1x8xf32>
    %24 = vector.broadcast %23 : vector<1x8xf32> to vector<8x8xf32>
    %25 = arith.addf %22, %24 : vector<8x8xf32>
    %c0_19 = arith.constant 0 : index
    %c0_20 = arith.constant 0 : index
    %26 = vector.load %arg8[%c0_19, %c0_20] : memref<8x8xf32, #tpu.memory_space<vmem>>, vector<8x8xf32>
    tpu.vector_store %arg8[%c0_19, %c0_20], %25 {strides = array<i32>} : memref<8x8xf32, #tpu.memory_space<vmem>>, vector<8x8xf32>,
    return
  }
  func.func @transform_0(%arg0: i32) -> (i32, i32) {
    %c0_i32 = arith.constant 0 : i32
    %c0_i32_0 = arith.constant 0 : i32
    return %arg0, %c0_i32 : i32, i32
  }
  func.func @transform_1(%arg0: i32) -> (i32, i32) {
    %c0_i32 = arith.constant 0 : i32
    %c0_i32_0 = arith.constant 0 : i32
    %c0_i32_1 = arith.constant 0 : i32
    return %c0_i32, %c0_i32_0 : i32, i32
  }
  func.func @transform_2(%arg0: i32) -> (i32, i32) {
    %c0_i32 = arith.constant 0 : i32
    %c0_i32_0 = arith.constant 0 : i32
    %c0_i32_1 = arith.constant 0 : i32
    return %c0_i32, %c0_i32_0 : i32, i32
  }
  func.func @transform_3(%arg0: i32) -> (i32, i32) {
    %c0_i32 = arith.constant 0 : i32
    %c0_i32_0 = arith.constant 0 : i32
    %c0_i32_1 = arith.constant 0 : i32
    return %c0_i32, %c0_i32_0 : i32, i32
  }
  func.func @transform_4(%arg0: i32) -> (i32, i32) {
    %c0_i32 = arith.constant 0 : i32
    %c0_i32_0 = arith.constant 0 : i32
    %c0_i32_1 = arith.constant 0 : i32
    return %c0_i32, %c0_i32_0 : i32, i32
  }
  func.func @transform_5(%arg0: i32) -> (i32, i32) {
    %c0_i32 = arith.constant 0 : i32
    %c0_i32_0 = arith.constant 0 : i32
    %c0_i32_1 = arith.constant 0 : i32
    return %c0_i32, %c0_i32_0 : i32, i32
  }
  func.func @transform_6(%arg0: i32) -> (i32, i32) {
    %c0_i32 = arith.constant 0 : i32
    %c0_i32_0 = arith.constant 0 : i32
    %c0_i32_1 = arith.constant 0 : i32
    return %c0_i32, %c0_i32_0 : i32, i32
  }
  func.func @transform_7(%arg0: i32) -> (i32, i32) {
    %c0_i32 = arith.constant 0 : i32
    %c0_i32_0 = arith.constant 0 : i32
    return %arg0, %c0_i32 : i32, i32
  }
}

</mosaic_0001>

<bundles_post_ra>
// kernel: tpu_custom_call.1
= control target key start
LH: loop header
LB: loop body
LE: loop exit
PB: predicated region body
PF: predicated region fallthrough
CT: control target
= control target key end

     0   :  { %v397_v2 = vmov 0.0|0.0   ;;  %vm398_vm0 = vmmov 0   ;;  %v399_v4 = vmov 0.0   ;;  %vm37_vm1 = vcmask 130048   ;;  %s501_s0 = inlined_call_operand.vmem [shape: f32[8,16], index: 0, kind: input, shape index: {}]   ;;  %s502_s1 = inlined_call_operand.vmem [shape: f32[16,64], index: 1, kind: input, shape index: {}]   ;;  %s503_s2 = inlined_call_operand.vmem [shape: f32[1,64], index: 2, kind: input, shape index: {}]   ;;  %s504_s3 = inlined_call_operand.vmem [shape: f32[64,8], index: 3, kind: input, shape index: {}]   ;;  %s505_s4 = inlined_call_operand.vmem [shape: f32[1,8], index: 4, kind: input, shape index: {}]   ;;  %s506_s5 = inlined_call_operand.vmem [shape: f32[8,8], index: 5, kind: input, shape index: {}]   ;;  %s507_s6 = inlined_call_operand.vmem [shape: f32[1,8], index: 6, kind: input, shape index: {}]   ;;  %s508_s7 = inlined_call_operand.hbm [shape: f32[8,8], index: 7, kind: output, shape index: {}]  }
   0x1   :  { %v28_v0 = vld [vmem:[%s502_s1] sm:$0xff]  ;;  %v29_v1 = vld [vmem:[%s502_s1 + $0x8] sm:$0xff]  ;;  %354 = vmatprep.subr.bf16.mxu0 %v397_v2  ;;  %327 = vmatprep.mubr.msk.f32.mxu0 %vm398_vm0, %v399_v4  ;;  %v116_v7 = vld [vmem:[%s504_s3 + $0x10] sm:$0xff] }
   0x2   :  { %v355_v3 = vpack.c.bf16 %v29_v1, %v28_v0  ;;  %v114_v5 = vld [vmem:[%s504_s3] sm:$0xff]  ;;  %v115_v6 = vld [vmem:[%s504_s3 + $0x8] sm:$0xff]  ;;  %357 = vmatprep.subr.bf16.mxu1 %v397_v2  ;;  %v117_v9 = vld [vmem:[%s504_s3 + $0x18] sm:$0xff]  ;;  %346 = vmatprep.mubr.msk.f32.mxu1 %vm398_vm0, %v399_v4 }
   0x3   :  { %v358_v8 = vpack.c.bf16 %v115_v6, %v114_v5  ;;  %v27_v10 = vld [vmem:[%s501_s0] sm:$0xff] }
   0x4   :  { %356 = vmatpush3.bf16.msra.mxu0 %v355_v3 }
   0x5   :  { %12 = vsyncpa [#allocation3], 0  ;;  %359 = vmatpush3.bf16.msra.mxu1 %v358_v8  ;;  %v361_v11 = vpack.c.bf16 %v117_v9, %v116_v7  ;;  %349 = vmatprep.subr.mxu0 %v399_v4  ;;  %v118_v12 = vld [vmem:[%s504_s3 + $0x20] sm:$0xff]  ;;  %v119_v13 = vld [vmem:[%s504_s3 + $0x28] sm:$0xff]  ;;  %vm129_vm3 = vcmask 523264   ;;  %vm214_vm5 = vcmask 64512  }
   0x6   :  { %360 = vmatprep.subr.bf16.mxu1 %v397_v2  ;;  %v364_v14 = vpack.c.bf16 %v119_v13, %v118_v12  ;;  %v120_v15 = vld [vmem:[%s504_s3 + $0x30] sm:$0xff]  ;;  %v121_v16 = vld [vmem:[%s504_s3 + $0x38] sm:$0xff]  ;;  %v303_v18 = vld [vmem:[%s503_s2] ss:$0 sm:$0xff]  ;;  %s400_s27 = smov [#allocation2]  }
   0x7   :  { %328 = vmatmul.mubr.msk.f32.vlgmr.msra.gmra.mrb[0].mxu0 %vm37_vm1, %v27_v10  ;;  %v367_v17 = vpack.c.bf16 %v121_v16, %v120_v15  ;;  %v206_v24 = vld [vmem:[%s506_s5] sm:$0xff]  ;;  %s295_s28 = sshll.u32 %s400_s27, 4  ;;  %s296_s28 = int_to_ptr.vmem [resolvable:$true] %s295_s28 }
   0x8   :  { %351 = vmatprep.mubr.msk.f32.mxu0 %vm398_vm0, %v399_v4  ;;  %350 = vmatpush3.msra.mxu0 %v206_v24  ;;  %v305_v25 = vld [vmem:[%s505_s4] ss:$0 sm:$0xff]  ;;  %s373_s4 = scalar_lea.vmem %s296_s28, 128  ;;  %p378_p1 = scmp.lt.s32.totalorder %s296_s28, %s296_s28 }
   0x9   :  { %362 = vmatpush3.bf16.msra.mxu1 %v361_v11  ;;  %v307_v31 = vld [vmem:[%s507_s6] ss:$0 sm:$0xff]  ;;  %p374_p0 = scmp.ne.s32.totalorder %s296_s28, %s373_s4  ;;  %p379_p2 = scmp.lt.s32.totalorder %s373_s4, %s373_s4 }
   0xa   :  { %363 = vmatprep.subr.bf16.mxu1 %v397_v2 }
   0xb   :  { %p380_p3 = por %p379_p2, %p378_p1 }
   0xd   :  { %365 = vmatpush3.bf16.msra.mxu1 %v364_v14  ;;  %p381_p4 = pnand %p380_p3, %p374_p0 }
   0xe   :  { %366 = vmatprep.subr.bf16.mxu1 %v397_v2 }
  0x11   :  { %368 = vmatpush3.bf16.msra.mxu1 %v367_v17 }
  0xda   :  { %v107_v19 = vpop.f32.mrb[0].mxu0 }
  0xdb   :  { %v108_v20 = vadd.f32 %v303_v18, %v107_v19  ;;  %v329_v21 = vpop.f32.mrb[1].mxu0 }
  0xdd   :  { %vm111_vm2 = vcmp.ge.f32.partialorder %v108_v20, 0.0  ;;  %v112_v22 = vmul.f32 0.01, %v108_v20 }
  0xdf   :  { %v113_v23 = vsel %vm111_vm2, %v108_v20, %v112_v22 }
  0xe0   :  { %347 = vmatmul.mubr.msk.f32.vlgmr.msra.gmra.mrb[0].mxu1 %vm129_vm3, %v113_v23 }
 0x1b3   :  { %v199_v26 = vpop.f32.mrb[0].mxu1 }
 0x1b4   :  { %v200_v27 = vadd.f32 %v305_v25, %v199_v26  ;;  %v348_v28 = vpop.f32.mrb[1].mxu1 }
 0x1b6   :  { %vm203_vm4 = vcmp.ge.f32.partialorder %v200_v27, 0.0  ;;  %v204_v29 = vmul.f32 0.01, %v200_v27 }
 0x1b8   :  { %v205_v30 = vsel %vm203_vm4, %v200_v27, %v204_v29 }
 0x1b9   :  { %352 = vmatmul.mubr.msk.f32.vlgmr.msra.gmra.mrb[2].mxu0 %vm214_vm5, %v205_v30 }
 0x28c   :  { %v284_v32 = vpop.f32.mrb[2].mxu0 }
 0x28d   :  { %v285_v33 = vadd.f32 %v307_v31, %v284_v32  ;;  %v353_v34 = vpop.f32.mrb[3].mxu0 }
 0x28f   :  { %288 = vst.msk [vmem:[#allocation2] sm:$0xff] %vm214_vm5, %v285_v33 }
 0x290   :  { %384 = shalt.err (!%p381_p4)
}
 0x291   :  { %s385_s30 = scalar_lea.hbm %s508_s7, 128 }
 0x292   :  { %p386_p5 = scmp.ne.s32.totalorder %s508_s7, %s385_s30  ;;  %p389_p6 = scmp.lt.u32.totalorder %s385_s30, %s508_s7 }
 0x294   :  { %p391_p7 = pnand %p389_p6, %p386_p5 }
 0x296   :  { %394 = shalt.err (!%p391_p7)
}
 0x297   :  { %298 = dma.vmem_to_hbm [thread:$0]  %s296_s28, 128, %s508_s7, [#allocation3]  }
 0x298   :  { %395 = dma.done.wait [#allocation3], 128  }
 0x299   :  { %396 = vsyncadd [#allocation3], 4294967168 }
 0x29a   :  { %302 = vsyncpa [#allocation3], 1 }

</bundles_post_ra>
